<compile_context>
chip_gen: v7x
topology: tpu7x:2x2x1
jax: 0.10.0
libtpu: 0.0.40
codegen_flags: <defaults>
</compile_context>

<pallas_src>
import jax
import jax.numpy as jnp
from jax.experimental import pallas as pl
from jax.experimental.pallas import tpu as pltpu

# Small, TPU-friendly stand-ins for the real dims (cnn/lm_embed_dim=768, clip=256).
B = 8            # batch
SEQ = 8          # token sequence length
VOCAB = 64       # stub vocab size
C, H, W = 3, 16, 16
CNN_EMBED = 128  # stand-in for cnn_embed_dim
LM_EMBED = 128   # stand-in for lm_embed_dim
CLIP_EMBED = 128 # stand-in for clip_embed_dim


def clip_fused_kernel(img_ref, tok_ref, vit_w_ref, vit_b_ref,
                      w_lm_ref, b_lm_ref, w_cnn_ref, b_cnn_ref,
                      lm_out_ref, cnn_out_ref, sim_ref, loss_ref):
    # ---- fused stub encoders -------------------------------------------------------
    # ViT stub: flatten (done at call boundary) + linear + tanh
    cnn_pooled = jnp.tanh(
        jnp.dot(img_ref[...], vit_w_ref[...], preferred_element_type=jnp.float32)
        + vit_b_ref[...])
    # BERT stub: mean-pool over the sequence axis + tanh  (tok_ref is (B, SEQ, LM_EMBED))
    lm_pooled = jnp.tanh(jnp.sum(tok_ref[...], axis=1) * (1.0 / tok_ref.shape[1]))

    # ---- CLIP head: nn.Linear projections (MXU matmuls, f32 accumulation) ----------
    lm_emb = jnp.dot(lm_pooled, w_lm_ref[...],
                     preferred_element_type=jnp.float32) + b_lm_ref[...]
    cnn_emb = jnp.dot(cnn_pooled, w_cnn_ref[...],
                      preferred_element_type=jnp.float32) + b_cnn_ref[...]

    # Returned embeddings are the *un-normalized* linear outputs (as in the reference).
    lm_out_ref[...] = lm_emb
    cnn_out_ref[...] = cnn_emb

    # ---- F.normalize(p=2, dim=1, eps=1e-12): x * rsqrt(max(||x||^2, eps^2)) --------
    eps_sq = 1e-24  # (1e-12)^2, representable in f32
    lm_n = lm_emb * jax.lax.rsqrt(
        jnp.maximum(jnp.sum(lm_emb * lm_emb, axis=-1, keepdims=True), eps_sq))
    cnn_n = cnn_emb * jax.lax.rsqrt(
        jnp.maximum(jnp.sum(cnn_emb * cnn_emb, axis=-1, keepdims=True), eps_sq))

    # ---- similarity matrix: lm_n @ cnn_n.T without materializing the transpose -----
    sim = jax.lax.dot_general(lm_n, cnn_n, (((1,), (1,)), ((), ())),
                              preferred_element_type=jnp.float32)   # (B, B)
    sim_ref[...] = sim

    # ---- symmetric cross entropy with labels = arange(B) ---------------------------
    # diag(sim)[i] = <lm_n[i], cnn_n[i]>  (row-wise dot, no iota/eye mask)
    diag = jnp.sum(lm_n * cnn_n, axis=-1, keepdims=True)             # (B, 1)

    # Row logsumexp (CE over sim) and column logsumexp (CE over sim.T) — the latter is a
    # reduction over axis 0, avoiding an explicit transpose of sim.
    m_r = jnp.max(sim, axis=-1, keepdims=True)
    lse_r = m_r + jnp.log(jnp.sum(jnp.exp(sim - m_r), axis=-1, keepdims=True))  # (B, 1)
    m_c = jnp.max(sim, axis=0, keepdims=True)
    lse_c = m_c + jnp.log(jnp.sum(jnp.exp(sim - m_c), axis=0, keepdims=True))   # (1, B)

    # (loss0 + loss1) / 2 with loss_k = mean(lse_k) - mean(diag)
    loss_ref[0, 0] = 0.5 * (jnp.mean(lse_r) + jnp.mean(lse_c)) - jnp.mean(diag)


def clip_fused(img_flat, tok_emb, vit_w, vit_b, w_lm, b_lm, w_cnn, b_cnn):
    bsz = img_flat.shape[0]
    vmem = pl.BlockSpec(memory_space=pltpu.MemorySpace.VMEM)
    smem = pl.BlockSpec(memory_space=pltpu.MemorySpace.SMEM)
    # NOTE: gridless single invocation; everything (< ~1 MiB total) fits VMEM on all of
    # v5e/v6e/v7x.  If batch grows, add a "parallel" grid axis over batch tiles for the
    # projection/normalize stage (v7x has 2 TCs) and keep the (B,B) sim/loss reduction
    # on an "arbitrary" axis or a second pass.
    return pl.pallas_call(
        clip_fused_kernel,
        out_shape=(
            jax.ShapeDtypeStruct((bsz, CLIP_EMBED), jnp.float32),  # lm_embedding
            jax.ShapeDtypeStruct((bsz, CLIP_EMBED), jnp.float32),  # cnn_embedding
            jax.ShapeDtypeStruct((bsz, bsz), jnp.float32),         # similarity_matrix
            jax.ShapeDtypeStruct((1, 1), jnp.float32),             # loss (scalar)
        ),
        in_specs=[vmem] * 8,
        out_specs=(vmem, vmem, vmem, smem),
    )(img_flat, tok_emb,
      vit_w, vit_b.reshape(1, -1),
      w_lm, b_lm.reshape(1, -1),
      w_cnn, b_cnn.reshape(1, -1))


def init_params(key):
    ks = jax.random.split(key, 6)
    s = 0.02
    return {
        # stub backbone params
        "vit_w": jax.random.normal(ks[0], (C * H * W, CNN_EMBED), jnp.float32) * s,
        "vit_b": jnp.zeros((CNN_EMBED,), jnp.float32),
        "bert_emb": jax.random.normal(ks[1], (VOCAB, LM_EMBED), jnp.float32) * s,
        # ClipModel.{cnn_linear, lm_linear}
        "cnn_linear_w": jax.random.normal(ks[2], (CNN_EMBED, CLIP_EMBED), jnp.float32) * s,
        "cnn_linear_b": jax.random.normal(ks[3], (CLIP_EMBED,), jnp.float32) * s,
        "lm_linear_w": jax.random.normal(ks[4], (LM_EMBED, CLIP_EMBED), jnp.float32) * s,
        "lm_linear_b": jax.random.normal(ks[5], (CLIP_EMBED,), jnp.float32) * s,
    }


def clip_model_forward(batch, params):
    # TODO(synk): the full ViTModel / BertModel backbones are not translated; they are
    # replaced with deterministic stub encoders whose pooled-output math (flatten+linear+
    # tanh for the image, mean-pool+tanh for token embeddings) is fused into the Pallas
    # kernel.  Only the data-dependent embedding-table gather stays in XLA.
    image = batch["image"]          # (B, C, H, W), NCHW
    input_ids = batch["input_ids"]  # (B, SEQ), int32
    img_flat = image.reshape(image.shape[0], -1)                 # free reshape
    tok = jnp.take(params["bert_emb"], input_ids, axis=0)        # (B, SEQ, LM_EMBED)

    lm_emb, cnn_emb, sim, loss = clip_fused(
        img_flat, tok,
        params["vit_w"], params["vit_b"],
        params["lm_linear_w"], params["lm_linear_b"],
        params["cnn_linear_w"], params["cnn_linear_b"])
    return {
        "lm_embedding": lm_emb,
        "cnn_embedding": cnn_emb,
        "similarity_matrix": sim,
        "loss": loss[0, 0],
    }


def _reference(batch, params):
    """Pure-JAX reference of the same forward (PyTorch semantics), for a silent check."""
    image = batch["image"]
    input_ids = batch["input_ids"]
    cnn_pooled = jnp.tanh(
        image.reshape(image.shape[0], -1) @ params["vit_w"] + params["vit_b"])
    lm_pooled = jnp.tanh(jnp.take(params["bert_emb"], input_ids, axis=0).mean(axis=1))
    lm_emb = lm_pooled @ params["lm_linear_w"] + params["lm_linear_b"]
    cnn_emb = cnn_pooled @ params["cnn_linear_w"] + params["cnn_linear_b"]
    lm_n = lm_emb / jnp.maximum(jnp.linalg.norm(lm_emb, axis=-1, keepdims=True), 1e-12)
    cnn_n = cnn_emb / jnp.maximum(jnp.linalg.norm(cnn_emb, axis=-1, keepdims=True), 1e-12)
    sim = lm_n @ cnn_n.T
    diag = jnp.diagonal(sim)
    loss0 = jnp.mean(jax.nn.logsumexp(sim, axis=-1) - diag)
    loss1 = jnp.mean(jax.nn.logsumexp(sim.T, axis=-1) - diag)
    return lm_emb, cnn_emb, sim, (loss0 + loss1) / 2


if __name__ == "__main__":
    key = jax.random.PRNGKey(0)
    k_img, k_ids, k_params = jax.random.split(key, 3)
    batch = {
        "image": jax.random.normal(k_img, (B, C, H, W), jnp.float32),
        "input_ids": jax.random.randint(k_ids, (B, SEQ), 0, VOCAB, jnp.int32),
    }
    params = init_params(k_params)

    out = clip_model_forward(batch, params)
    jax.block_until_ready(out)

    # Silent correctness check (rsqrt-normalize + in-kernel tanh vs sqrt/divide + XLA tanh
    # in the reference -> slightly looser tolerances, per review guidance).
    ref_lm, ref_cnn, ref_sim, ref_loss = _reference(batch, params)
    assert jnp.allclose(out["lm_embedding"], ref_lm, atol=1e-3, rtol=1e-3)
    assert jnp.allclose(out["cnn_embedding"], ref_cnn, atol=1e-3, rtol=1e-3)
    assert jnp.allclose(out["similarity_matrix"], ref_sim, atol=2e-3, rtol=2e-3)
    assert jnp.allclose(out["loss"], ref_loss, atol=2e-3, rtol=2e-3)

    print("KERNEL_OK")
</pallas_src>

<mosaic_0001>
module attributes {stable_mosaic.version = 11 : i64} {
  func.func @clip_fused_kernel(%arg0: memref<8x768xf32, #tpu.memory_space<vmem>>, %arg1: memref<8x8x128xf32, #tpu.memory_space<vmem>>, %arg2: memref<768x128xf32, #tpu.memory_space<vmem>>, %arg3: memref<1x128xf32, #tpu.memory_space<vmem>>, %arg4: memref<128x128xf32, #tpu.memory_space<vmem>>, %arg5: memref<1x128xf32, #tpu.memory_space<vmem>>, %arg6: memref<128x128xf32, #tpu.memory_space<vmem>>, %arg7: memref<1x128xf32, #tpu.memory_space<vmem>>, %arg8: memref<8x128xf32, #tpu.memory_space<vmem>>, %arg9: memref<8x128xf32, #tpu.memory_space<vmem>>, %arg10: memref<8x8xf32, #tpu.memory_space<vmem>>, %arg11: memref<1x1xf32, #tpu.memory_space<smem>>) attributes {dimension_semantics = [], scalar_prefetch = 0 : i64, scratch_operands = 0 : i64, tpu.core_type = #tpu.core_type<tc>} {
    %c0 = arith.constant 0 : index
    %c0_0 = arith.constant 0 : index
    %0 = vector.load %arg0[%c0, %c0_0] : memref<8x768xf32, #tpu.memory_space<vmem>>, vector<8x768xf32>
    %c0_1 = arith.constant 0 : index
    %c0_2 = arith.constant 0 : index
    %1 = vector.load %arg2[%c0_1, %c0_2] : memref<768x128xf32, #tpu.memory_space<vmem>>, vector<768x128xf32>
    %cst = arith.constant dense<0.000000e+00> : vector<8x128xf32>
    %2 = tpu.matmul %0, %1, %cst {dimension_numbers = #tpu.dot_dimension_numbers<[1], [0], [0], [1], [0, 0, 1, 1], [], []>} : vector<8x768xf32>, vector<768x128xf32>, vector<8x128xf32> -> vector<8x128xf32>
    %c0_3 = arith.constant 0 : index
    %c0_4 = arith.constant 0 : index
    %3 = vector.load %arg3[%c0_3, %c0_4] : memref<1x128xf32, #tpu.memory_space<vmem>>, vector<1x128xf32>
    %4 = vector.broadcast %3 : vector<1x128xf32> to vector<8x128xf32>
    %5 = arith.addf %2, %4 : vector<8x128xf32>
    %6 = math.tanh %5 : vector<8x128xf32>
    %c0_5 = arith.constant 0 : index
    %c0_6 = arith.constant 0 : index
    %c0_7 = arith.constant 0 : index
    %7 = vector.load %arg1[%c0_5, %c0_6, %c0_7] : memref<8x8x128xf32, #tpu.memory_space<vmem>>, vector<8x8x128xf32>
    %cst_8 = arith.constant dense<0.000000e+00> : vector<8x128xf32>
    %8 = vector.multi_reduction <add>, %7, %cst_8 [1] : vector<8x8x128xf32> to vector<8x128xf32>
    %cst_9 = arith.constant 1.250000e-01 : f32
    %9 = vector.broadcast %cst_9 : f32 to vector<8x128xf32>
    %10 = arith.mulf %8, %9 : vector<8x128xf32>
    %11 = math.tanh %10 : vector<8x128xf32>
    %c0_10 = arith.constant 0 : index
    %c0_11 = arith.constant 0 : index
    %12 = vector.load %arg4[%c0_10, %c0_11] : memref<128x128xf32, #tpu.memory_space<vmem>>, vector<128x128xf32>
    %cst_12 = arith.constant dense<0.000000e+00> : vector<8x128xf32>
    %13 = tpu.matmul %11, %12, %cst_12 {dimension_numbers = #tpu.dot_dimension_numbers<[1], [0], [0], [1], [0, 0, 1, 1], [], []>} : vector<8x128xf32>, vector<128x128xf32>, vector<8x128xf32> -> vector<8x128xf32>
    %c0_13 = arith.constant 0 : index
    %c0_14 = arith.constant 0 : index
    %14 = vector.load %arg5[%c0_13, %c0_14] : memref<1x128xf32, #tpu.memory_space<vmem>>, vector<1x128xf32>
    %15 = vector.broadcast %14 : vector<1x128xf32> to vector<8x128xf32>
    %16 = arith.addf %13, %15 : vector<8x128xf32>
    %c0_15 = arith.constant 0 : index
    %c0_16 = arith.constant 0 : index
    %17 = vector.load %arg6[%c0_15, %c0_16] : memref<128x128xf32, #tpu.memory_space<vmem>>, vector<128x128xf32>
    %cst_17 = arith.constant dense<0.000000e+00> : vector<8x128xf32>
    %18 = tpu.matmul %6, %17, %cst_17 {dimension_numbers = #tpu.dot_dimension_numbers<[1], [0], [0], [1], [0, 0, 1, 1], [], []>} : vector<8x128xf32>, vector<128x128xf32>, vector<8x128xf32> -> vector<8x128xf32>
    %c0_18 = arith.constant 0 : index
    %c0_19 = arith.constant 0 : index
    %19 = vector.load %arg7[%c0_18, %c0_19] : memref<1x128xf32, #tpu.memory_space<vmem>>, vector<1x128xf32>
    %20 = vector.broadcast %19 : vector<1x128xf32> to vector<8x128xf32>
    %21 = arith.addf %18, %20 : vector<8x128xf32>
    %c0_20 = arith.constant 0 : index
    %c0_21 = arith.constant 0 : index
    %22 = vector.load %arg8[%c0_20, %c0_21] : memref<8x128xf32, #tpu.memory_space<vmem>>, vector<8x128xf32>
    tpu.vector_store %arg8[%c0_20, %c0_21], %16 {strides = array<i32>} : memref<8x128xf32, #tpu.memory_space<vmem>>, vector<8x128xf32>,
    %c0_22 = arith.constant 0 : index
    %c0_23 = arith.constant 0 : index
    %23 = vector.load %arg9[%c0_22, %c0_23] : memref<8x128xf32, #tpu.memory_space<vmem>>, vector<8x128xf32>
    tpu.vector_store %arg9[%c0_22, %c0_23], %21 {strides = array<i32>} : memref<8x128xf32, #tpu.memory_space<vmem>>, vector<8x128xf32>,
    %24 = arith.mulf %16, %16 : vector<8x128xf32>
    %cst_24 = arith.constant dense<0.000000e+00> : vector<8xf32>
    %25 = vector.multi_reduction <add>, %24, %cst_24 [1] : vector<8x128xf32> to vector<8xf32>
    %26 = vector.shape_cast %25 : vector<8xf32> to vector<8x1xf32>
    %cst_25 = arith.constant 1.000000e-24 : f32
    %27 = vector.broadcast %cst_25 : f32 to vector<8x1xf32>
    %28 = arith.maximumf %26, %27 : vector<8x1xf32>
    %29 = math.rsqrt %28 : vector<8x1xf32>
    %30 = vector.broadcast %29 : vector<8x1xf32> to vector<8x128xf32>
    %31 = arith.mulf %16, %30 : vector<8x128xf32>
    %32 = arith.mulf %21, %21 : vector<8x128xf32>
    %cst_26 = arith.constant dense<0.000000e+00> : vector<8xf32>
    %33 = vector.multi_reduction <add>, %32, %cst_26 [1] : vector<8x128xf32> to vector<8xf32>
    %34 = vector.shape_cast %33 : vector<8xf32> to vector<8x1xf32>
    %cst_27 = arith.constant 1.000000e-24 : f32
    %35 = vector.broadcast %cst_27 : f32 to vector<8x1xf32>
    %36 = arith.maximumf %34, %35 : vector<8x1xf32>
    %37 = math.rsqrt %36 : vector<8x1xf32>
    %38 = vector.broadcast %37 : vector<8x1xf32> to vector<8x128xf32>
    %39 = arith.mulf %21, %38 : vector<8x128xf32>
    %cst_28 = arith.constant dense<0.000000e+00> : vector<8x8xf32>
    %40 = tpu.matmul %31, %39, %cst_28 {dimension_numbers = #tpu.dot_dimension_numbers<[1], [1], [0], [0], [0, 0, 1, 0], [], []>} : vector<8x128xf32>, vector<8x128xf32>, vector<8x8xf32> -> vector<8x8xf32>
    %c0_29 = arith.constant 0 : index
    %c0_30 = arith.constant 0 : index
    %41 = vector.load %arg10[%c0_29, %c0_30] : memref<8x8xf32, #tpu.memory_space<vmem>>, vector<8x8xf32>
    tpu.vector_store %arg10[%c0_29, %c0_30], %40 {strides = array<i32>} : memref<8x8xf32, #tpu.memory_space<vmem>>, vector<8x8xf32>,
    %42 = arith.mulf %31, %39 : vector<8x128xf32>
    %cst_31 = arith.constant dense<0.000000e+00> : vector<8xf32>
    %43 = vector.multi_reduction <add>, %42, %cst_31 [1] : vector<8x128xf32> to vector<8xf32>
    %44 = vector.shape_cast %43 : vector<8xf32> to vector<8x1xf32>
    %cst_32 = arith.constant dense<0xFF800000> : vector<8xf32>
    %45 = vector.multi_reduction <maximumf>, %40, %cst_32 [1] : vector<8x8xf32> to vector<8xf32>
    %46 = vector.shape_cast %45 : vector<8xf32> to vector<8x1xf32>
    %47 = vector.broadcast %46 : vector<8x1xf32> to vector<8x8xf32>
    %48 = arith.subf %40, %47 : vector<8x8xf32>
    %49 = math.exp %48 : vector<8x8xf32>
    %cst_33 = arith.constant dense<0.000000e+00> : vector<8xf32>
    %50 = vector.multi_reduction <add>, %49, %cst_33 [1] : vector<8x8xf32> to vector<8xf32>
    %51 = vector.shape_cast %50 : vector<8xf32> to vector<8x1xf32>
    %52 = math.log %51 : vector<8x1xf32>
    %53 = arith.addf %46, %52 : vector<8x1xf32>
    %cst_34 = arith.constant dense<0xFF800000> : vector<8xf32>
    %54 = vector.multi_reduction <maximumf>, %40, %cst_34 [0] : vector<8x8xf32> to vector<8xf32>
    %55 = vector.shape_cast %54 : vector<8xf32> to vector<1x8xf32>
    %56 = vector.broadcast %55 : vector<1x8xf32> to vector<8x8xf32>
    %57 = arith.subf %40, %56 : vector<8x8xf32>
    %58 = math.exp %57 : vector<8x8xf32>
    %cst_35 = arith.constant dense<0.000000e+00> : vector<8xf32>
    %59 = vector.multi_reduction <add>, %58, %cst_35 [0] : vector<8x8xf32> to vector<8xf32>
    %60 = vector.shape_cast %59 : vector<8xf32> to vector<1x8xf32>
    %61 = math.log %60 : vector<1x8xf32>
    %62 = arith.addf %55, %61 : vector<1x8xf32>
    %63 = vector.shape_cast %53 : vector<8x1xf32> to vector<1x8x1xf32>
    %cst_36 = arith.constant dense<0.000000e+00> : vector<1xf32>
    %64 = vector.multi_reduction <add>, %63, %cst_36 [1, 2] : vector<1x8x1xf32> to vector<1xf32>
    %65 = vector.shape_cast %64 : vector<1xf32> to vector<1x1x1xf32>
    %66 = vector.extract %65[0, 0, 0] : f32 from vector<1x1x1xf32>
    %cst_37 = arith.constant 8.000000e+00 : f32
    %67 = arith.divf %66, %cst_37 : f32
    %68 = vector.shape_cast %62 : vector<1x8xf32> to vector<1x1x8xf32>
    %cst_38 = arith.constant dense<0.000000e+00> : vector<1xf32>
    %69 = vector.multi_reduction <add>, %68, %cst_38 [1, 2] : vector<1x1x8xf32> to vector<1xf32>
    %70 = vector.shape_cast %69 : vector<1xf32> to vector<1x1x1xf32>
    %71 = vector.extract %70[0, 0, 0] : f32 from vector<1x1x1xf32>
    %cst_39 = arith.constant 8.000000e+00 : f32
    %72 = arith.divf %71, %cst_39 : f32
    %73 = arith.addf %67, %72 : f32
    %cst_40 = arith.constant 5.000000e-01 : f32
    %74 = arith.mulf %cst_40, %73 : f32
    %75 = vector.shape_cast %44 : vector<8x1xf32> to vector<1x8x1xf32>
    %cst_41 = arith.constant dense<0.000000e+00> : vector<1xf32>
    %76 = vector.multi_reduction <add>, %75, %cst_41 [1, 2] : vector<1x8x1xf32> to vector<1xf32>
    %77 = vector.shape_cast %76 : vector<1xf32> to vector<1x1x1xf32>
    %78 = vector.extract %77[0, 0, 0] : f32 from vector<1x1x1xf32>
    %cst_42 = arith.constant 8.000000e+00 : f32
    %79 = arith.divf %78, %cst_42 : f32
    %80 = arith.subf %74, %79 : f32
    %c0_43 = arith.constant 0 : index
    %c0_44 = arith.constant 0 : index
    %81 = memref.load %arg11[%c0_43, %c0_44] : memref<1x1xf32, #tpu.memory_space<smem>>
    memref.store %80, %arg11[%c0_43, %c0_44] : memref<1x1xf32, #tpu.memory_space<smem>>
    return
  }
}

</mosaic_0001>

<bundles_post_ra>
// kernel: tpu_custom_call.1
= control target key start
LH: loop header
LB: loop body
LE: loop exit
PB: predicated region body
PF: predicated region fallthrough
CT: control target
= control target key end

     0   :  { %17 = vsyncpa [#allocation3], 0  ;;  %s1763_s0 = inlined_call_operand.hbm [shape: f32[8,768], index: 0, kind: input, shape index: {}]   ;;  %s1764_s1 = inlined_call_operand.hbm [shape: f32[8,8,128], index: 1, kind: input, shape index: {}]   ;;  %s1765_s2 = inlined_call_operand.hbm [shape: f32[768,128], index: 2, kind: input, shape index: {}]   ;;  %s1766_s3 = inlined_call_operand.vmem [shape: f32[1,128], index: 3, kind: input, shape index: {}]   ;;  %s1767_s4 = inlined_call_operand.hbm [shape: f32[128,128], index: 4, kind: input, shape index: {}]   ;;  %s1768_s5 = inlined_call_operand.vmem [shape: f32[1,128], index: 5, kind: input, shape index: {}]   ;;  %s1769_s6 = inlined_call_operand.hbm [shape: f32[128,128], index: 6, kind: input, shape index: {}]   ;;  %s1770_s7 = inlined_call_operand.vmem [shape: f32[1,128], index: 7, kind: input, shape index: {}]   ;;  %s1771_s8 = inlined_call_operand.hbm [shape: f32[8,128], index: 8, kind: output, shape index: {0}]   ;;  %s1772_s9 = inlined_call_operand.hbm [shape: f32[8,128], index: 9, kind: output, shape index: {1}]   ;;  %s1773_s10 = inlined_call_operand.hbm [shape: f32[8,8], index: 10, kind: output, shape index: {2}]   ;;  %s1774_s11 = inlined_call_operand.hbm [shape: f32[1,1], index: 11, kind: output, shape index: {3}]  }
   0x1   :  { %18 = vsyncpa [#allocation7], 0 }
   0x2   :  { %19 = vsyncpa [#allocation10], 0 }
   0x3   :  { %20 = vsyncpa [#allocation4], 0 }
   0x4   :  { %21 = vsyncpa [#allocation14], 0 }
   0x5   :  { %22 = vsyncpa [#allocation5], 0  ;;  %s1537_s17 = smov [#allocation6]   ;;  %s1339_s21 = scalar_lea.hbm %s1764_s1, 1024 }
   0x6   :  { %s38_s18 = sshll.u32 %s1537_s17, 4  ;;  %p1340_p0 = scmp.ne.s32.totalorder %s1764_s1, %s1339_s21  ;;  %s39_s18 = int_to_ptr.vmem [resolvable:$true] %s38_s18 }
   0x7   :  { %p1343_p1 = scmp.lt.u32.totalorder %s1339_s21, %s1764_s1 }
   0x9   :  { %p1345_p2 = pnand %p1343_p1, %p1340_p0 }
   0xb   :  { %1348 = shalt.err (!%p1345_p2)
}
   0xc   :  { %s1349_s26 = scalar_lea.vmem %s39_s18, 1024  ;;  %p1354_p4 = scmp.lt.s32.totalorder %s39_s18, %s39_s18 }
   0xd   :  { %p1350_p3 = scmp.ne.s32.totalorder %s39_s18, %s1349_s26  ;;  %p1355_p5 = scmp.lt.s32.totalorder %s1349_s26, %s1349_s26 }
   0xf   :  { %p1356_p6 = por %p1355_p5, %p1354_p4 }
  0x11   :  { %p1357_p7 = pnand %p1356_p6, %p1350_p3 }
  0x13   :  { %1360 = shalt.err (!%p1357_p7)
}
  0x14   :  { %s1538_s27 = smov 128   ;;  %s1539_s28 = smov 8  }
  0x15   :  { %44 = dma.hbm_to_vmem [thread:$0]  %s1764_s1, 1024, %s39_s18, [#allocation7], %s1538_s27, %s1538_s27, %s1539_s28  }
  0x16   :  { %s1540_s12 = smov [#allocation9]   ;;  %s1541_s14 = smov [#allocation2]  }
  0x17   :  { %s64_s13 = sshll.u32 %s1540_s12, 4  ;;  %s29_s15 = sshll.u32 %s1541_s14, 4  ;;  %s65_s13 = int_to_ptr.vmem [resolvable:$true] %s64_s13  ;;  %s30_s15 = int_to_ptr.vmem [resolvable:$true] %s29_s15 }
  0x18   :  { %s1361_s19 = scalar_lea.hbm %s1767_s4, 2048 }
  0x19   :  { %p1362_p8 = scmp.ne.s32.totalorder %s1767_s4, %s1361_s19  ;;  %p1365_p9 = scmp.lt.u32.totalorder %s1361_s19, %s1767_s4 }
  0x1b   :  { %p1367_p10 = pnand %p1365_p9, %p1362_p8 }
  0x1d   :  { %1370 = shalt.err (!%p1367_p10)
}
  0x1e   :  { %s1371_s1 = scalar_lea.vmem %s65_s13, 2048  ;;  %p1376_p12 = scmp.lt.s32.totalorder %s65_s13, %s65_s13 }
  0x1f   :  { %p1372_p11 = scmp.ne.s32.totalorder %s65_s13, %s1371_s1  ;;  %p1377_p13 = scmp.lt.s32.totalorder %s1371_s1, %s1371_s1 }
  0x21   :  { %p1378_p0 = por %p1377_p13, %p1376_p12 }
  0x23   :  { %p1379_p1 = pnand %p1378_p0, %p1372_p11 }
  0x25   :  { %1382 = shalt.err (!%p1379_p1)
}
  0x26   :  { %70 = dma.hbm_to_vmem [thread:$0]  %s1767_s4, 2048, %s65_s13, [#allocation10], %s1538_s27, %s1538_s27, %s1539_s28  }
  0x27   :  { %s1383_s29 = scalar_lea.hbm %s1763_s0, 768 }
  0x28   :  { %p1384_p2 = scmp.ne.s32.totalorder %s1763_s0, %s1383_s29  ;;  %p1387_p3 = scmp.lt.u32.totalorder %s1383_s29, %s1763_s0 }
  0x2a   :  { %p1389_p4 = pnand %p1387_p3, %p1384_p2 }
  0x2c   :  { %1392 = shalt.err (!%p1389_p4)
}
  0x2d   :  { %s1393_s17 = scalar_lea.vmem %s30_s15, 768  ;;  %p1398_p6 = scmp.lt.s32.totalorder %s30_s15, %s30_s15 }
  0x2e   :  { %p1394_p5 = scmp.ne.s32.totalorder %s30_s15, %s1393_s17  ;;  %p1399_p7 = scmp.lt.s32.totalorder %s1393_s17, %s1393_s17 }
  0x30   :  { %p1400_p8 = por %p1399_p7, %p1398_p6 }
  0x32   :  { %p1401_p9 = pnand %p1400_p8, %p1394_p5 }
  0x34   :  { %1404 = shalt.err (!%p1401_p9)
}
  0x35   :  { %32 = dma.hbm_to_vmem [thread:$0]  %s1763_s0, 768, %s30_s15, [#allocation3]  }
  0x36   :  { %s1542_s19 = smov [#allocation8]   ;;  %s1543_s21 = smov [#allocation11]  }
  0x37   :  { %s50_s20 = sshll.u32 %s1542_s19, 4  ;;  %s78_s22 = sshll.u32 %s1543_s21, 4  ;;  %s51_s20 = int_to_ptr.vmem [resolvable:$true] %s50_s20  ;;  %s79_s22 = int_to_ptr.vmem [resolvable:$true] %s78_s22 }
  0x38   :  { %s1405_s18 = scalar_lea.hbm %s1765_s2, 12288 }
  0x39   :  { %p1406_p10 = scmp.ne.s32.totalorder %s1765_s2, %s1405_s18  ;;  %p1409_p11 = scmp.lt.u32.totalorder %s1405_s18, %s1765_s2 }
  0x3b   :  { %p1411_p12 = pnand %p1409_p11, %p1406_p10 }
  0x3d   :  { %1414 = shalt.err (!%p1411_p12)
}
  0x3e   :  { %s1415_s0 = scalar_lea.vmem %s51_s20, 12288  ;;  %p1420_p0 = scmp.lt.s32.totalorder %s51_s20, %s51_s20 }
  0x3f   :  { %p1416_p13 = scmp.ne.s32.totalorder %s51_s20, %s1415_s0  ;;  %p1421_p1 = scmp.lt.s32.totalorder %s1415_s0, %s1415_s0 }
  0x41   :  { %p1422_p2 = por %p1421_p1, %p1420_p0 }
  0x43   :  { %p1423_p3 = pnand %p1422_p2, %p1416_p13 }
  0x45   :  { %1426 = shalt.err (!%p1423_p3)
}
  0x46   :  { %56 = dma.hbm_to_vmem [thread:$0]  %s1765_s2, 12288, %s51_s20, [#allocation7], %s1538_s27, %s1538_s27, %s1539_s28  }
  0x47   :  { %s1427_s16 = scalar_lea.hbm %s1769_s6, 2048 }
  0x48   :  { %p1428_p4 = scmp.ne.s32.totalorder %s1769_s6, %s1427_s16  ;;  %p1431_p5 = scmp.lt.u32.totalorder %s1427_s16, %s1769_s6 }
  0x4a   :  { %p1433_p6 = pnand %p1431_p5, %p1428_p4 }
  0x4c   :  { %1436 = shalt.err (!%p1433_p6)
}
  0x4d   :  { %s1437_s21 = scalar_lea.vmem %s79_s22, 2048  ;;  %p1442_p8 = scmp.lt.s32.totalorder %s79_s22, %s79_s22 }
  0x4e   :  { %p1438_p7 = scmp.ne.s32.totalorder %s79_s22, %s1437_s21  ;;  %p1443_p9 = scmp.lt.s32.totalorder %s1437_s21, %s1437_s21 }
  0x50   :  { %p1444_p10 = por %p1443_p9, %p1442_p8 }
  0x52   :  { %p1445_p11 = pnand %p1444_p10, %p1438_p7 }
  0x54   :  { %1448 = shalt.err (!%p1445_p11)
}
  0x55   :  { %84 = dma.hbm_to_vmem [thread:$0]  %s1769_s6, 2048, %s79_s22, [#allocation10], %s1538_s27, %s1538_s27, %s1539_s28  }
  0x56   :  { %1525 = dma.done.wait [#allocation3], 768  }
  0x57   :  { %1526 = vsyncadd [#allocation3], 4294966528 }
  0x58   :  { %1527 = dma.done.wait [#allocation7], 13312  }
  0x59   :  { %1528 = vsyncadd [#allocation7], 4294953984 }
  0x5a   :  { %1529 = dma.done.wait [#allocation10], 4096  }
  0x5b   :  { %1530 = vsyncadd [#allocation10], 4294963200  ;;  %v124_v0 = vld [vmem:[#allocation8 + $0x80] sm:$0xff]  ;;  %v125_v1 = vld [vmem:[#allocation8 + $0x88] sm:$0xff]  ;;  %vm1545_vm0 = vmmov 0   ;;  %vm525_vm1 = vcmask 1041409  }
  0x5c   :  { %v108_v2 = vld [vmem:[#allocation8] sm:$0xff]  ;;  %v1145_v3 = vpack.c.bf16 %v125_v1, %v124_v0  ;;  %v109_v4 = vld [vmem:[#allocation8 + $0x8] sm:$0xff]  ;;  %v126_v11 = vld [vmem:[#allocation8 + $0x90] sm:$0xff]  ;;  %vm527_vm2 = vcmask 1042434   ;;  %vm529_vm3 = vcmask 1043459   ;;  %vm531_vm4 = vcmask 1044484  }
  0x5d   :  { %v156_v5 = vld [vmem:[#allocation8 + $0x180] sm:$0xff]  ;;  %v157_v6 = vld [vmem:[#allocation8 + $0x188] sm:$0xff]  ;;  %v1147_v7 = vpack.c.bf16 %v109_v4, %v108_v2  ;;  %v127_v13 = vld [vmem:[#allocation8 + $0x98] sm:$0xff]  ;;  %vm533_vm5 = vcmask 1045509   ;;  %vm535_vm6 = vcmask 1046534   ;;  %vm537_vm7 = vcmask 1047559  }
  0x5e   :  { %v1177_v8 = vpack.c.bf16 %v157_v6, %v156_v5  ;;  %v140_v9 = vld [vmem:[#allocation8 + $0x100] sm:$0xff]  ;;  %v141_v10 = vld [vmem:[#allocation8 + $0x108] sm:$0xff]  ;;  %1146 = vmatprep.subr.bf16.mxu0 %v1145_v3  ;;  %v110_v14 = vld [vmem:[#allocation8 + $0x10] sm:$0xff]  ;;  %v1149_v16 = vpack.c.bf16 %v127_v13, %v126_v11  ;;  %vm787_vm8 = vcmask 64512   ;;  %vm837_vm9 = vcmask 57344   ;;  %s1548_s1 = smov [#allocation12]  }
  0x5f   :  { %v1179_v12 = vpack.c.bf16 %v141_v10, %v140_v9  ;;  %v111_v15 = vld [vmem:[#allocation8 + $0x18] sm:$0xff]  ;;  %1148 = vmatpush3.bf16.msra.mxu0 %v1147_v7  ;;  %v158_v18 = vld [vmem:[#allocation8 + $0x190] sm:$0xff]  ;;  %v128_v23 = vld [vmem:[#allocation8 + $0xa0] sm:$0xff]  ;;  %vm823_vm10 = vcmask 7168   ;;  %s875_s18 = sshll.u32 %s1548_s1, 4  ;;  %s876_s18 = int_to_ptr.vmem [resolvable:$true] %s875_s18 }
  0x60   :  { %1178 = vmatprep.subr.bf16.mxu1 %v1177_v8  ;;  %v1151_v17 = vpack.c.bf16 %v111_v15, %v110_v14  ;;  %v159_v19 = vld [vmem:[#allocation8 + $0x198] sm:$0xff]  ;;  %v142_v20 = vld [vmem:[#allocation8 + $0x110] sm:$0xff]  ;;  %v129_v24 = vld [vmem:[#allocation8 + $0xa8] sm:$0xff]  ;;  %1150 = vmatprep.subr.bf16.mxu0 %v1149_v16 }
  0x61   :  { %1180 = vmatpush3.bf16.msra.mxu1 %v1179_v12  ;;  %v1181_v21 = vpack.c.bf16 %v159_v19, %v158_v18  ;;  %v143_v22 = vld [vmem:[#allocation8 + $0x118] sm:$0xff]  ;;  %v1153_v26 = vpack.c.bf16 %v129_v24, %v128_v23  ;;  %v112_v27 = vld [vmem:[#allocation8 + $0x20] sm:$0xff]  ;;  %v113_v28 = vld [vmem:[#allocation8 + $0x28] sm:$0xff] }
  0x62   :  { %v1183_v25 = vpack.c.bf16 %v143_v22, %v142_v20  ;;  %v160_v29 = vld [vmem:[#allocation8 + $0x1a0] sm:$0xff]  ;;  %v161_v30 = vld [vmem:[#allocation8 + $0x1a8] sm:$0xff]  ;;  %v1155_v33 = vpack.c.bf16 %v113_v28, %v112_v27  ;;  %v130_v35 = vld [vmem:[#allocation8 + $0xb0] sm:$0xff] }
  0x63   :  { %1182 = vmatprep.subr.bf16.mxu1 %v1181_v21  ;;  %v144_v31 = vld [vmem:[#allocation8 + $0x120] sm:$0xff]  ;;  %v145_v32 = vld [vmem:[#allocation8 + $0x128] sm:$0xff]  ;;  %1152 = vmatpush3.bf16.msra.mxu0 %v1151_v17  ;;  %v1185_v34 = vpack.c.bf16 %v161_v30, %v160_v29  ;;  %v131_v36 = vld [vmem:[#allocation8 + $0xb8] sm:$0xff] }
  0x64   :  { %v114_v37 = vld [vmem:[#allocation8 + $0x30] sm:$0xff]  ;;  %1154 = vmatprep.subr.bf16.mxu0 %v1153_v26  ;;  %v1187_v38 = vpack.c.bf16 %v145_v32, %v144_v31  ;;  %v1157_v39 = vpack.c.bf16 %v131_v36, %v130_v35  ;;  %v115_v40 = vld [vmem:[#allocation8 + $0x38] sm:$0xff]  ;;  %v132_v46 = vld [vmem:[#allocation8 + $0xc0] sm:$0xff] }
  0x65   :  { %1184 = vmatpush3.bf16.msra.mxu1 %v1183_v25  ;;  %v162_v41 = vld [vmem:[#allocation8 + $0x1b0] sm:$0xff]  ;;  %v163_v42 = vld [vmem:[#allocation8 + $0x1b8] sm:$0xff]  ;;  %v133_v47 = vld [vmem:[#allocation8 + $0xc8] sm:$0xff]  ;;  %v1159_v48 = vpack.c.bf16 %v115_v40, %v114_v37 }
  0x66   :  { %1186 = vmatprep.subr.bf16.mxu1 %v1185_v34  ;;  %v1189_v43 = vpack.c.bf16 %v163_v42, %v162_v41  ;;  %v146_v44 = vld [vmem:[#allocation8 + $0x130] sm:$0xff]  ;;  %v147_v45 = vld [vmem:[#allocation8 + $0x138] sm:$0xff]  ;;  %v164_v49 = vld [vmem:[#allocation8 + $0x1c0] sm:$0xff]  ;;  %v1161_v52 = vpack.c.bf16 %v133_v47, %v132_v46 }
  0x67   :  { %1156 = vmatpush3.bf16.msra.mxu0 %v1155_v33  ;;  %v165_v50 = vld [vmem:[#allocation8 + $0x1c8] sm:$0xff]  ;;  %v1191_v51 = vpack.c.bf16 %v147_v45, %v146_v44  ;;  %v116_v53 = vld [vmem:[#allocation8 + $0x40] sm:$0xff]  ;;  %v134_v58 = vld [vmem:[#allocation8 + $0xd0] sm:$0xff] }
  0x68   :  { %1158 = vmatprep.subr.bf16.mxu0 %v1157_v39  ;;  %v117_v54 = vld [vmem:[#allocation8 + $0x48] sm:$0xff]  ;;  %v148_v55 = vld [vmem:[#allocation8 + $0x140] sm:$0xff]  ;;  %v1193_v56 = vpack.c.bf16 %v165_v50, %v164_v49  ;;  %v135_v59 = vld [vmem:[#allocation8 + $0xd8] sm:$0xff] }
  0x69   :  { %1188 = vmatpush3.bf16.msra.mxu1 %v1187_v38  ;;  %v149_v57 = vld [vmem:[#allocation8 + $0x148] sm:$0xff]  ;;  %v166_v60 = vld [vmem:[#allocation8 + $0x1d0] sm:$0xff]  ;;  %v167_v61 = vld [vmem:[#allocation8 + $0x1d8] sm:$0xff]  ;;  %v1163_v62 = vpack.c.bf16 %v117_v54, %v116_v53  ;;  %v1165_v0 = vpack.c.bf16 %v135_v59, %v134_v58 }
  0x6a   :  { %1190 = vmatprep.subr.bf16.mxu1 %v1189_v43  ;;  %v1195_v63 = vpack.c.bf16 %v149_v57, %v148_v55  ;;  %v118_v1 = vld [vmem:[#allocation8 + $0x50] sm:$0xff]  ;;  %v119_v2 = vld [vmem:[#allocation8 + $0x58] sm:$0xff]  ;;  %v1197_v4 = vpack.c.bf16 %v167_v61, %v166_v60  ;;  %v136_v6 = vld [vmem:[#allocation8 + $0xe0] sm:$0xff] }
  0x6b   :  { %1160 = vmatpush3.bf16.msra.mxu0 %v1159_v48  ;;  %v150_v3 = vld [vmem:[#allocation8 + $0x150] sm:$0xff]  ;;  %v151_v5 = vld [vmem:[#allocation8 + $0x158] sm:$0xff]  ;;  %v137_v7 = vld [vmem:[#allocation8 + $0xe8] sm:$0xff]  ;;  %v1167_v10 = vpack.c.bf16 %v119_v2, %v118_v1 }
  0x6c   :  { %1162 = vmatprep.subr.bf16.mxu0 %v1161_v52  ;;  %v168_v8 = vld [vmem:[#allocation8 + $0x1e0] sm:$0xff]  ;;  %v169_v9 = vld [vmem:[#allocation8 + $0x1e8] sm:$0xff]  ;;  %v103_v12 = vld [vmem:[#allocation2 + $0x8] sm:$0xff]  ;;  %v1199_v13 = vpack.c.bf16 %v151_v5, %v150_v3  ;;  %v1169_v14 = vpack.c.bf16 %v137_v7, %v136_v6 }
  0x6d   :  { %1192 = vmatpush3.bf16.msra.mxu1 %v1191_v51  ;;  %v120_v11 = vld [vmem:[#allocation8 + $0x60] sm:$0xff]  ;;  %v121_v15 = vld [vmem:[#allocation8 + $0x68] sm:$0xff]  ;;  %v1201_v18 = vpack.c.bf16 %v169_v9, %v168_v8  ;;  %v138_v19 = vld [vmem:[#allocation8 + $0xf0] sm:$0xff]  ;;  %275 = vmatprep.mubr.f32.mxu0 %v103_v12 }
  0x6e   :  { %1194 = vmatprep.subr.bf16.mxu1 %v1193_v56  ;;  %v152_v16 = vld [vmem:[#allocation8 + $0x160] sm:$0xff]  ;;  %v153_v17 = vld [vmem:[#allocation8 + $0x168] sm:$0xff]  ;;  %v139_v20 = vld [vmem:[#allocation8 + $0xf8] sm:$0xff]  ;;  %v1171_v24 = vpack.c.bf16 %v121_v15, %v120_v11 }
  0x6f   :  { %1164 = vmatpush3.bf16.msra.mxu0 %v1163_v62  ;;  %v105_v21 = vld [vmem:[#allocation2 + $0x18] sm:$0xff]  ;;  %v170_v22 = vld [vmem:[#allocation8 + $0x1f0] sm:$0xff]  ;;  %v171_v23 = vld [vmem:[#allocation8 + $0x1f8] sm:$0xff]  ;;  %v1203_v25 = vpack.c.bf16 %v153_v17, %v152_v16  ;;  %v1173_v26 = vpack.c.bf16 %v139_v20, %v138_v19 }
  0x70   :  { %1166 = vmatprep.subr.bf16.mxu0 %v1165_v0  ;;  %345 = vmatprep.mubr.f32.mxu1 %v105_v21  ;;  %v122_v27 = vld [vmem:[#allocation8 + $0x70] sm:$0xff]  ;;  %v123_v28 = vld [vmem:[#allocation8 + $0x78] sm:$0xff]  ;;  %v1205_v30 = vpack.c.bf16 %v171_v23, %v170_v22  ;;  %v188_v32 = vld [vmem:[#allocation8 + $0x280] sm:$0xff] }
  0x71   :  { %1196 = vmatpush3.bf16.msra.mxu1 %v1195_v63  ;;  %v154_v29 = vld [vmem:[#allocation8 + $0x170] sm:$0xff]  ;;  %v155_v31 = vld [vmem:[#allocation8 + $0x178] sm:$0xff]  ;;  %v189_v33 = vld [vmem:[#allocation8 + $0x288] sm:$0xff]  ;;  %v1175_v34 = vpack.c.bf16 %v123_v28, %v122_v27 }
  0x72   :  { %1198 = vmatprep.subr.bf16.mxu1 %v1197_v4  ;;  %v1207_v35 = vpack.c.bf16 %v155_v31, %v154_v29  ;;  %v1209_v36 = vpack.c.bf16 %v189_v33, %v188_v32  ;;  %v172_v37 = vld [vmem:[#allocation8 + $0x200] sm:$0xff]  ;;  %v173_v38 = vld [vmem:[#allocation8 + $0x208] sm:$0xff]  ;;  %v190_v39 = vld [vmem:[#allocation8 + $0x290] sm:$0xff] }
  0x73   :  { %1168 = vmatpush3.bf16.msra.mxu0 %v1167_v10  ;;  %v191_v40 = vld [vmem:[#allocation8 + $0x298] sm:$0xff]  ;;  %v102_v41 = vld [vmem:[#allocation2] sm:$0xff]  ;;  %v1211_v42 = vpack.c.bf16 %v173_v38, %v172_v37  ;;  %v104_v43 = vld [vmem:[#allocation2 + $0x10] sm:$0xff] }
  0x74   :  { %1170 = vmatprep.subr.bf16.mxu0 %v1169_v14  ;;  %v1213_v44 = vpack.c.bf16 %v191_v40, %v190_v39  ;;  %v174_v45 = vld [vmem:[#allocation8 + $0x210] sm:$0xff]  ;;  %v175_v46 = vld [vmem:[#allocation8 + $0x218] sm:$0xff]  ;;  %v192_v47 = vld [vmem:[#allocation8 + $0x2a0] sm:$0xff] }
  0x75   :  { %1200 = vmatpush3.bf16.msra.mxu1 %v1199_v13  ;;  %v193_v48 = vld [vmem:[#allocation8 + $0x2a8] sm:$0xff]  ;;  %v107_v49 = vld [vmem:[#allocation2 + $0x28] sm:$0xff]  ;;  %v1215_v50 = vpack.c.bf16 %v175_v46, %v174_v45  ;;  %v176_v52 = vld [vmem:[#allocation8 + $0x220] sm:$0xff] }
  0x76   :  { %1202 = vmatprep.subr.bf16.mxu1 %v1201_v18  ;;  %v1217_v51 = vpack.c.bf16 %v193_v48, %v192_v47  ;;  %v177_v53 = vld [vmem:[#allocation8 + $0x228] sm:$0xff]  ;;  %v194_v54 = vld [vmem:[#allocation8 + $0x2b0] sm:$0xff]  ;;  %v195_v55 = vld [vmem:[#allocation8 + $0x2b8] sm:$0xff] }
  0x77   :  { %1172 = vmatpush3.bf16.msra.mxu0 %v1171_v24  ;;  %v1219_v56 = vpack.c.bf16 %v177_v53, %v176_v52  ;;  %v1221_v57 = vpack.c.bf16 %v195_v55, %v194_v54  ;;  %v178_v58 = vld [vmem:[#allocation8 + $0x230] sm:$0xff]  ;;  %v179_v59 = vld [vmem:[#allocation8 + $0x238] sm:$0xff]  ;;  %v196_v60 = vld [vmem:[#allocation8 + $0x2c0] sm:$0xff] }
  0x78   :  { %1174 = vmatprep.subr.bf16.mxu0 %v1173_v26  ;;  %v197_v61 = vld [vmem:[#allocation8 + $0x2c8] sm:$0xff]  ;;  %v1223_v62 = vpack.c.bf16 %v179_v59, %v178_v58  ;;  %v180_v0 = vld [vmem:[#allocation8 + $0x240] sm:$0xff]  ;;  %v198_v2 = vld [vmem:[#allocation8 + $0x2d0] sm:$0xff] }
  0x79   :  { %1204 = vmatpush3.bf16.msra.mxu1 %v1203_v25  ;;  %v1225_v63 = vpack.c.bf16 %v197_v61, %v196_v60  ;;  %v181_v1 = vld [vmem:[#allocation8 + $0x248] sm:$0xff]  ;;  %v199_v3 = vld [vmem:[#allocation8 + $0x2d8] sm:$0xff]  ;;  %v182_v6 = vld [vmem:[#allocation8 + $0x250] sm:$0xff]  ;;  %v1544_v25 = vmov 0.0|0.0  }
  0x7a   :  { %1206 = vmatprep.subr.bf16.mxu1 %v1205_v30  ;;  %v1227_v4 = vpack.c.bf16 %v181_v1, %v180_v0  ;;  %v1229_v5 = vpack.c.bf16 %v199_v3, %v198_v2  ;;  %v183_v7 = vld [vmem:[#allocation8 + $0x258] sm:$0xff]  ;;  %v200_v8 = vld [vmem:[#allocation8 + $0x2e0] sm:$0xff]  ;;  %v201_v9 = vld [vmem:[#allocation8 + $0x2e8] sm:$0xff] }
  0x7b   :  { %1176 = vmatpush3.bf16.msra.mxu0 %v1175_v34  ;;  %v1231_v10 = vpack.c.bf16 %v183_v7, %v182_v6  ;;  %v1233_v11 = vpack.c.bf16 %v201_v9, %v200_v8  ;;  %v184_v12 = vld [vmem:[#allocation8 + $0x260] sm:$0xff]  ;;  %v185_v13 = vld [vmem:[#allocation8 + $0x268] sm:$0xff]  ;;  %v202_v14 = vld [vmem:[#allocation8 + $0x2f0] sm:$0xff] }
  0x7c   :  { %1210 = vmatprep.subr.bf16.mxu0 %v1209_v36  ;;  %v203_v15 = vld [vmem:[#allocation8 + $0x2f8] sm:$0xff]  ;;  %v1235_v16 = vpack.c.bf16 %v185_v13, %v184_v12  ;;  %v186_v18 = vld [vmem:[#allocation8 + $0x270] sm:$0xff]  ;;  %v610_v22 = vld [vmem:[#allocation11] sm:$0xff] }
  0x7d   :  { %1208 = vmatpush3.bf16.msra.mxu1 %v1207_v35  ;;  %v1237_v17 = vpack.c.bf16 %v203_v15, %v202_v14  ;;  %v187_v19 = vld [vmem:[#allocation8 + $0x278] sm:$0xff]  ;;  %v106_v21 = vld [vmem:[#allocation2 + $0x20] sm:$0xff]  ;;  %v611_v23 = vld [vmem:[#allocation11 + $0x8] sm:$0xff] }
  0x7e   :  { %276 = vmatmul.mubr.f32.vlgmr.msra.gmra.mrb[0].mxu0 %v102_v41  ;;  %v1239_v20 = vpack.c.bf16 %v187_v19, %v186_v18  ;;  %v494_v24 = vld [vmem:[#allocation9] sm:$0xff]  ;;  %v1266_v26 = vpack.c.bf16 %v611_v23, %v610_v22  ;;  %1241 = vmatprep.subr.bf16.mxu1 %v1544_v25  ;;  %v495_v27 = vld [vmem:[#allocation9 + $0x8] sm:$0xff]  ;;  %v612_v28 = vld [vmem:[#allocation11 + $0x10] sm:$0xff] }
  0x7f   :  { %1212 = vmatpush3.bf16.msra.mxu0 %v1211_v42  ;;  %415 = vmatprep.mubr.f32.mxu0 %v107_v49  ;;  %v613_v29 = vld [vmem:[#allocation11 + $0x18] sm:$0xff]  ;;  %v1242_v30 = vpack.c.bf16 %v495_v27, %v494_v24  ;;  %v496_v31 = vld [vmem:[#allocation9 + $0x10] sm:$0xff]  ;;  %v614_v35 = vld [vmem:[#allocation11 + $0x20] sm:$0xff] }
  0x80   :  { %346 = vmatmul.mubr.f32.vlgmr.msra.gmra.mrb[0].mxu1 %v104_v43  ;;  %1214 = vmatprep.subr.bf16.mxu0 %v1213_v44  ;;  %v497_v32 = vld [vmem:[#allocation9 + $0x18] sm:$0xff]  ;;  %v1269_v33 = vpack.c.bf16 %v613_v29, %v612_v28  ;;  %v615_v36 = vld [vmem:[#allocation11 + $0x28] sm:$0xff]  ;;  %v498_v37 = vld [vmem:[#allocation9 + $0x20] sm:$0xff] }
  0x81   :  { %1243 = vmatpush3.bf16.msra.mxu1 %v1242_v30  ;;  %v1245_v34 = vpack.c.bf16 %v497_v32, %v496_v31  ;;  %v499_v38 = vld [vmem:[#allocation9 + $0x28] sm:$0xff]  ;;  %v1272_v39 = vpack.c.bf16 %v615_v36, %v614_v35  ;;  %v616_v41 = vld [vmem:[#allocation11 + $0x30] sm:$0xff]  ;;  %v617_v42 = vld [vmem:[#allocation11 + $0x38] sm:$0xff] }
  0x82   :  { %1244 = vmatprep.subr.bf16.mxu1 %v1544_v25  ;;  %v1248_v40 = vpack.c.bf16 %v499_v38, %v498_v37  ;;  %v1275_v43 = vpack.c.bf16 %v617_v42, %v616_v41  ;;  %v422_v44 = vld [vmem:[#allocation6] sm:$0xff]  ;;  %v423_v45 = vld [vmem:[#allocation6 + $0x8] sm:$0xff]  ;;  %v424_v46 = vld [vmem:[#allocation6 + $0x10] sm:$0xff] }
  0x83   :  { %1216 = vmatpush3.bf16.msra.mxu0 %v1215_v50  ;;  %v430_v47 = vrot.slane %v422_v44, 4  ;;  %v436_v48 = vrot.slane %v423_v45, 4  ;;  %v425_v49 = vld [vmem:[#allocation6 + $0x18] sm:$0xff]  ;;  %v442_v50 = vrot.slane %v424_v46, 4  ;;  %v427_v55 = vld [vmem:[#allocation6 + $0x28] sm:$0xff]  ;;  %v428_v58 = vld [vmem:[#allocation6 + $0x30] sm:$0xff] }
  0x84   :  { %1218 = vmatprep.subr.bf16.mxu0 %v1217_v51  ;;  %v426_v51 = vld [vmem:[#allocation6 + $0x20] sm:$0xff]  ;;  %v448_v54 = vrot.slane %v425_v49, 4  ;;  %v466_v2 = vrot.slane %v428_v58, 4  ;;  %v500_v19 = vld [vmem:[#allocation9 + $0x30] sm:$0xff]  ;;  %v619_v28 = vld [vmem:[#allocation11 + $0x48] sm:$0xff] }
  0x85   :  { %1246 = vmatpush3.bf16.msra.mxu1 %v1245_v34  ;;  %v431_v52 = vadd.f32 %v430_v47, %v422_v44  ;;  %v437_v53 = vadd.f32 %v436_v48, %v423_v45  ;;  %v618_v27 = vld [vmem:[#allocation11 + $0x40] sm:$0xff]  ;;  %v503_v41 = vld [vmem:[#allocation9 + $0x48] sm:$0xff]  ;;  %v620_v47 = vld [vmem:[#allocation11 + $0x50] sm:$0xff] }
  0x86   :  { %1247 = vmatprep.subr.bf16.mxu1 %v1544_v25  ;;  %v449_v61 = vadd.f32 %v448_v54, %v425_v49  ;;  %v467_v9 = vadd.f32 %v466_v2, %v428_v58  ;;  %v1278_v32 = vpack.c.bf16 %v619_v28, %v618_v27  ;;  %v621_v48 = vld [vmem:[#allocation11 + $0x58] sm:$0xff] }
  0x87   :  { %1220 = vmatpush3.bf16.msra.mxu0 %v1219_v56  ;;  %v443_v56 = vadd.f32 %v442_v50, %v424_v46  ;;  %v432_v59 = vrot.slane %v431_v52, 2  ;;  %v438_v60 = vrot.slane %v437_v53, 2  ;;  %v625_v2 = vld [vmem:[#allocation11 + $0x78] sm:$0xff] }
  0x88   :  { %1222 = vmatprep.subr.bf16.mxu0 %v1221_v57  ;;  %v454_v57 = vrot.slane %v426_v51, 4 }
  0x89   :  { %1249 = vmatpush3.bf16.msra.mxu1 %v1248_v40  ;;  %v444_v0 = vrot.slane %v443_v56, 2  ;;  %v433_v3 = vadd.f32 %v432_v59, %v431_v52  ;;  %v502_v40 = vld [vmem:[#allocation9 + $0x40] sm:$0xff] }
  0x8a   :  { %1250 = vmatprep.subr.bf16.mxu1 %v1544_v25  ;;  %v455_v1 = vadd.f32 %v454_v57, %v426_v51  ;;  %v1254_v46 = vpack.c.bf16 %v503_v41, %v502_v40  ;;  %v1281_v51 = vpack.c.bf16 %v621_v48, %v620_v47  ;;  %v622_v57 = vld [vmem:[#allocation11 + $0x60] sm:$0xff] }
  0x8b   :  { %1224 = vmatpush3.bf16.msra.mxu0 %v1223_v62  ;;  %v460_v62 = vrot.slane %v427_v55, 4  ;;  %v445_v7 = vadd.f32 %v444_v0, %v443_v56  ;;  %v505_v56 = vld [vmem:[#allocation9 + $0x58] sm:$0xff] }
  0x8c   :  { %1226 = vmatprep.subr.bf16.mxu0 %v1225_v63  ;;  %v429_v63 = vld [vmem:[#allocation6 + $0x38] sm:$0xff]  ;;  %v456_v8 = vrot.slane %v455_v1, 2 }
  0x8d   :  { %v461_v6 = vadd.f32 %v460_v62, %v427_v55  ;;  %v446_v15 = vrot.slane %v445_v7, 1  ;;  %v504_v55 = vld [vmem:[#allocation9 + $0x50] sm:$0xff]  ;;  %v507_v62 = vld [vmem:[#allocation9 + $0x68] sm:$0xff] }
  0x8e   :  { %v1257_v59 = vpack.c.bf16 %v505_v56, %v504_v55 }
  0x8f   :  { %1228 = vmatpush3.bf16.msra.mxu0 %v1227_v4  ;;  %v439_v4 = vadd.f32 %v438_v60, %v437_v53  ;;  %v462_v14 = vrot.slane %v461_v6, 2  ;;  %v447_v29 = vadd.f32 %v446_v15, %v445_v7  ;;  %v623_v60 = vld [vmem:[#allocation11 + $0x68] sm:$0xff]  ;;  %v509_v7 = vld [vmem:[#allocation9 + $0x78] sm:$0xff] }
  0x90   :  { %1230 = vmatprep.subr.bf16.mxu0 %v1229_v5  ;;  %v450_v5 = vrot.slane %v449_v61, 2  ;;  %v1284_v0 = vpack.c.bf16 %v623_v60, %v622_v57 }
  0x91   :  { %v440_v12 = vrot.slane %v439_v4, 1  ;;  %v463_v24 = vadd.f32 %v462_v14, %v461_v6  ;;  %v480_v44 = vmul.f32 0.125, %v447_v29  ;;  %v508_v6 = vld [vmem:[#allocation9 + $0x70] sm:$0xff] }
  0x92   :  { %v451_v13 = vadd.f32 %v450_v5, %v449_v61  ;;  %v506_v61 = vld [vmem:[#allocation9 + $0x60] sm:$0xff] }
  0x93   :  { %1232 = vmatpush3.bf16.msra.mxu0 %v1231_v10  ;;  %v472_v10 = vrot.slane %v429_v63, 4  ;;  %v441_v22 = vadd.f32 %v440_v12, %v439_v4  ;;  %v464_v34 = vrot.slane %v463_v24, 1  ;;  %v1260_v4 = vpack.c.bf16 %v507_v62, %v506_v61 }
  0x94   :  { %1234 = vmatprep.subr.bf16.mxu0 %v1233_v11  ;;  %v434_v11 = vrot.slane %v433_v3, 1  ;;  %v452_v23 = vrot.slane %v451_v13, 1 }
  0x95   :  { %v473_v18 = vadd.f32 %v472_v10, %v429_v63  ;;  %v465_v42 = vadd.f32 %v464_v34, %v463_v24  ;;  %v1546_v63 = vmov 0.0   ;;  %v926_v24 = vld [vmem:[%s1766_s3] ss:$0 sm:$0xff] }
  0x96   :  { %1102 = vmatprep.mubr.msk.f32.mxu1 %vm1545_vm0, %v1546_v63 }
  0x97   :  { %1236 = vmatpush3.bf16.msra.mxu0 %v1235_v16  ;;  %v457_v16 = vadd.f32 %v456_v8, %v455_v1  ;;  %v474_v35 = vrot.slane %v473_v18, 2  ;;  %v483_v53 = vmul.f32 0.125, %v465_v42  ;;  %v624_v1 = vld [vmem:[#allocation11 + $0x70] sm:$0xff] }
  0x98   :  { %1238 = vmatprep.subr.bf16.mxu0 %v1237_v17  ;;  %v468_v17 = vrot.slane %v467_v9, 2  ;;  %v1287_v5 = vpack.c.bf16 %v625_v2, %v624_v1  ;;  %v928_v42 = vld [vmem:[%s1770_s7] ss:$0 sm:$0xff] }
  0x99   :  { %v458_v30 = vrot.slane %v457_v16, 1 }
  0x9a   :  { %v469_v31 = vadd.f32 %v468_v17, %v467_v9  ;;  %v1263_v9 = vpack.c.bf16 %v509_v7, %v508_v6 }
  0x9b   :  { %1240 = vmatpush3.bf16.msra.mxu0 %v1239_v20  ;;  %v501_v20 = vld [vmem:[#allocation9 + $0x38] sm:$0xff]  ;;  %v459_v36 = vadd.f32 %v458_v30, %v457_v16 }
  0x9c   :  { %1265 = vmatprep.subr.bf16.mxu0 %v1544_v25  ;;  %v470_v37 = vrot.slane %v469_v31, 1 }
  0x9d   :  { %v482_v50 = vmul.f32 0.125, %v459_v36 }
  0x9e   :  { %416 = vmatmul.mubr.f32.vlgmr.msra.gmra.mrb[2].mxu0 %v106_v21  ;;  %v435_v21 = vadd.f32 %v434_v11, %v433_v3  ;;  %v471_v49 = vadd.f32 %v470_v37, %v469_v31 }
  0x9f   :  { %1267 = vmatpush3.bf16.msra.mxu0 %v1266_v26  ;;  %v1251_v26 = vpack.c.bf16 %v501_v20, %v500_v19  ;;  %1137 = vmatprep.mubr.msk.f32.mxu0 %vm1545_vm0, %v1546_v63 }
  0xa0   :  { %1268 = vmatprep.subr.bf16.mxu0 %v1544_v25  ;;  %v478_v38 = vmul.f32 0.125, %v435_v21  ;;  %v484_v54 = vmul.f32 0.125, %v471_v49 }
  0xa1   :  { %1252 = vmatpush3.bf16.msra.mxu1 %v1251_v26 }
  0xa2   :  { %1253 = vmatprep.subr.bf16.mxu1 %v1544_v25  ;;  %1309 = vtanh.f32 %v478_v38  ;;  %v927_v38 = vld [vmem:[%s1768_s5] ss:$0 sm:$0xff]  ;;  %s1547_s5 = smov [#allocation13]  }
  0xa3   :  { %1270 = vmatpush3.bf16.msra.mxu0 %v1269_v33  ;;  %v453_v33 = vadd.f32 %v452_v23, %v451_v13  ;;  %s885_s7 = sshll.u32 %s1547_s5, 4  ;;  %s886_s7 = int_to_ptr.vmem [resolvable:$true] %s885_s7 }
  0xa4   :  { %1271 = vmatprep.subr.bf16.mxu0 %v1544_v25  ;;  %s1449_s24 = scalar_lea.vmem %s886_s7, 128  ;;  %p1454_p13 = scmp.lt.s32.totalorder %s886_s7, %s886_s7 }
  0xa5   :  { %v481_v45 = vmul.f32 0.125, %v453_v33  ;;  %1255 = vmatpush3.bf16.msra.mxu1 %v1254_v46  ;;  %p1450_p12 = scmp.ne.s32.totalorder %s886_s7, %s1449_s24  ;;  %p1455_p0 = scmp.lt.s32.totalorder %s1449_s24, %s1449_s24 }
  0xa6   :  { %1256 = vmatprep.subr.bf16.mxu1 %v1544_v25 }
  0xa7   :  { %1273 = vmatpush3.bf16.msra.mxu0 %v1272_v39  ;;  %v479_v39 = vmul.f32 0.125, %v441_v22  ;;  %p1456_p1 = por %p1455_p0, %p1454_p13 }
  0xa8   :  { %1274 = vmatprep.subr.bf16.mxu0 %v1544_v25 }
  0xa9   :  { %1311 = vtanh.f32 %v479_v39  ;;  %1258 = vmatpush3.bf16.msra.mxu1 %v1257_v59  ;;  %p1457_p2 = pnand %p1456_p1, %p1450_p12 }
  0xaa   :  { %1313 = vtanh.f32 %v480_v44  ;;  %1259 = vmatprep.subr.bf16.mxu1 %v1544_v25 }
  0xab   :  { %1276 = vmatpush3.bf16.msra.mxu0 %v1275_v43  ;;  %v475_v43 = vadd.f32 %v474_v35, %v473_v18  ;;  %1315 = vtanh.f32 %v481_v45 }
  0xac   :  { %1277 = vmatprep.subr.bf16.mxu0 %v1544_v25  ;;  %1317 = vtanh.f32 %v482_v50  ;;  %v1310_v8 = vpop.eup %1309 }
  0xad   :  { %v476_v52 = vrot.slane %v475_v43, 1  ;;  %1319 = vtanh.f32 %v483_v53  ;;  %1261 = vmatpush3.bf16.msra.mxu1 %v1260_v4 }
  0xae   :  { %1321 = vtanh.f32 %v484_v54  ;;  %1262 = vmatprep.subr.bf16.mxu1 %v1544_v25 }
  0xaf   :  { %1279 = vmatpush3.bf16.msra.mxu0 %v1278_v32  ;;  %v477_v58 = vadd.f32 %v476_v52, %v475_v43 }
  0xb0   :  { %1280 = vmatprep.subr.bf16.mxu0 %v1544_v25 }
  0xb1   :  { %v485_v3 = vmul.f32 0.125, %v477_v58  ;;  %1264 = vmatpush3.bf16.msra.mxu1 %v1263_v9 }
  0xb2   :  { %1140 = vmatprep.subr.mxu1 %v1546_v63 }
  0xb3   :  { %1282 = vmatpush3.bf16.msra.mxu0 %v1281_v51  ;;  %1323 = vtanh.f32 %v485_v3  ;;  %v1312_v10 = vpop.eup %1311 }
  0xb4   :  { %1283 = vmatprep.subr.bf16.mxu0 %v1544_v25  ;;  %v1314_v11 = vpop.eup %1313  ;;  %v526_v12 = vsel %vm525_vm1, %v1312_v10, %v1310_v8 }
  0xb5   :  { %v1316_v13 = vpop.eup %1315  ;;  %v528_v14 = vsel %vm527_vm2, %v1314_v11, %v526_v12 }
  0xb6   :  { %v1318_v15 = vpop.eup %1317  ;;  %v530_v16 = vsel %vm529_vm3, %v1316_v13, %v528_v14 }
  0xb7   :  { %1285 = vmatpush3.bf16.msra.mxu0 %v1284_v0  ;;  %v1320_v17 = vpop.eup %1319  ;;  %v532_v18 = vsel %vm531_vm4, %v1318_v15, %v530_v16 }
  0xb8   :  { %1286 = vmatprep.subr.bf16.mxu0 %v1544_v25  ;;  %v1322_v19 = vpop.eup %1321  ;;  %v534_v20 = vsel %vm533_vm5, %v1320_v17, %v532_v18 }
  0xb9   :  { %v536_v22 = vsel %vm535_vm6, %v1322_v19, %v534_v20 }
  0xbb   :  { %1288 = vmatpush3.bf16.msra.mxu0 %v1287_v5 }
  0xbd   :  { %v1324_v21 = vpop.eup %1323 }
  0xbe   :  { %v538_v25 = vsel %vm537_vm7, %v1324_v21, %v536_v22 }
  0xbf   :  { %1103 = vmatmul.mubr.f32.vlgmr.msra.gmra.mrb[2].mxu1 %v538_v25 }
  0xc0   :  { %1142 = vmatprep.mubr.msk.f32.mxu1 %vm1545_vm0, %v1546_v63 }
 0x151   :  { %v961_v23 = vpop.f32.mrb[0].mxu0 }
 0x152   :  { %v962_v26 = vpop.f32.mrb[1].mxu0 }
 0x153   :  { %v996_v27 = vpop.f32.mrb[0].mxu1  ;;  %v963_v28 = vadd.f32 %v962_v26, %v961_v23 }
 0x154   :  { %v997_v29 = vpop.f32.mrb[1].mxu1 }
 0x155   :  { %v998_v30 = vadd.f32 %v997_v29, %v996_v27  ;;  %v278_v31 = vadd.f32 %v963_v28, %v926_v24 }
 0x157   :  { %v348_v32 = vadd.f32 %v998_v30, %v278_v31 }
 0x171   :  { %v1031_v33 = vpop.f32.mrb[2].mxu0 }
 0x172   :  { %v1032_v34 = vpop.f32.mrb[3].mxu0 }
 0x173   :  { %v1033_v35 = vadd.f32 %v1032_v34, %v1031_v33 }
 0x175   :  { %v418_v36 = vadd.f32 %v1033_v35, %v348_v32 }
 0x177   :  { %1325 = vtanh.f32 %v418_v36 }
 0x181   :  { %v1326_v37 = vpop.eup %1325 }
 0x182   :  { %1138 = vmatmul.mubr.f32.vlgmr.msra.gmra.mrb[4].mxu0 %v1326_v37 }
 0x192   :  { %v606_v39 = vpop.f32.mrb[2].mxu1 }
 0x193   :  { %v607_v40 = vadd.f32 %v927_v38, %v606_v39  ;;  %v1104_v41 = vpop.f32.mrb[3].mxu1 }
 0x195   :  { %703 = vst [vmem:[#allocation12] sm:$0xff] %v607_v40  ;;  %v705_v47 = vmul.f32 %v607_v40, %v607_v40 }
 0x255   :  { %v699_v43 = vpop.f32.mrb[4].mxu0 }
 0x256   :  { %v700_v44 = vadd.f32 %v928_v42, %v699_v43  ;;  %v1139_v45 = vpop.f32.mrb[5].mxu0 }
 0x258   :  { %704 = vst [vmem:[#allocation13] sm:$0xff] %v700_v44  ;;  %v711_v46 = vmul.f32 %v700_v44, %v700_v44 }
 0x25a   :  { %712 = vadd.xlane.f32.xlu0 %v711_v46 }
 0x25e   :  { %706 = vadd.xlane.f32.xlu0 %v705_v47 }
 0x2e7   :  { %v713_v48 = vpop.xlane.xlu0 %712 }
 0x2e8   :  { %v714_v49 = vmax.f32 %v713_v48, 1e-24 }
 0x2ea   :  { %1327 = vrsqrt.f32 %v714_v49 }
 0x2eb   :  { %v707_v50 = vpop.xlane.xlu0 %706 }
 0x2ec   :  { %v708_v51 = vmax.f32 %v707_v50, 1e-24 }
 0x2ee   :  { %1329 = vrsqrt.f32 %v708_v51 }
 0x2f4   :  { %v1328_v52 = vpop.eup %1327 }
 0x2f5   :  { %v716_v53 = vmul.f32 %v1328_v52, %v700_v44 }
 0x2f7   :  { %1141 = vmatpush3.xpose.msra.mxu1 %v716_v53 }
 0x2f8   :  { %v1330_v54 = vpop.eup %1329 }
 0x2f9   :  { %v710_v55 = vmul.f32 %v1330_v54, %v607_v40 }
 0x2fb   :  { %1143 = vmatmul.mubr.f32.vlgmr.msra.gmra.mrb[4].mxu1 %v710_v55  ;;  %v789_v56 = vmul.f32 %v716_v53, %v710_v55 }
 0x2fd   :  { %790 = vadd.xlane.f32.xlu0 %v789_v56 }
 0x38a   :  { %v791_v26 = vpop.xlane.xlu0 %790 }
 0x38b   :  { %v853_v27 = vsel %vm823_vm10, %v791_v26, 0.0 }
 0x3ce   :  { %v783_v57 = vpop.f32.mrb[4].mxu1 }
 0x3cf   :  { %v1144_v58 = vpop.f32.mrb[5].mxu1  ;;  %v792_v59 = vsel %vm787_vm8, %v783_v57, -inf  ;;  %788 = vst.msk [vmem:[#allocation15] sm:$0xff] %vm787_vm8, %v783_v57 }
 0x3d0   :  { %793 = vmax.xlane.f32.xlu1 %v792_v59  ;;  %v804_v60 = vrot.slane %v792_v59, 4 }
 0x3d2   :  { %v805_v61 = vmax.f32 %v792_v59, %v804_v60 }
 0x3d4   :  { %v806_v62 = vrot.slane %v805_v61, 2 }
 0x3d6   :  { %v807_v63 = vmax.f32 %v805_v61, %v806_v62 }
 0x3d8   :  { %v808_v0 = vrot.slane %v807_v63, 1 }
 0x3da   :  { %v809_v1 = vmax.f32 %v807_v63, %v808_v0 }
 0x3dc   :  { %v810_v2 = vsub.f32 %v783_v57, %v809_v1 }
 0x3de   :  { %v811_v3 = vmul.f32 1.442695, %v810_v2 }
 0x3e0   :  { %1331 = vpow2.f32 %v811_v3 }
 0x3ea   :  { %v1332_v4 = vpop.eup %1331 }
 0x3eb   :  { %v813_v5 = vsel %vm787_vm8, %v1332_v4, 0.0 }
 0x3ec   :  { %v814_v6 = vrot.slane %v813_v5, 4 }
 0x3ee   :  { %v815_v7 = vadd.f32 %v814_v6, %v813_v5 }
 0x3f0   :  { %v816_v8 = vrot.slane %v815_v7, 2 }
 0x3f2   :  { %v817_v9 = vadd.f32 %v816_v8, %v815_v7 }
 0x3f4   :  { %v818_v10 = vrot.slane %v817_v9, 1 }
 0x3f6   :  { %v819_v11 = vadd.f32 %v818_v10, %v817_v9 }
 0x3f8   :  { %1333 = vlog2.f32 %v819_v11 }
 0x402   :  { %v1334_v12 = vpop.eup %1333 }
 0x403   :  { %v821_v13 = vmul.f32 0.6931472, %v1334_v12 }
 0x405   :  { %v822_v14 = vadd.f32 %v821_v13, %v809_v1 }
 0x407   :  { %v838_v15 = vsel %vm837_vm9, %v822_v14, 0.0 }
 0x408   :  { %839 = vadd.xlane.f32.xlu0 %v838_v15 }
 0x45d   :  { %v794_v16 = vpop.xlane.xlu1 %793 }
 0x45e   :  { %v795_v17 = vsub.f32 %v783_v57, %v794_v16 }
 0x460   :  { %v796_v18 = vmul.f32 1.442695, %v795_v17 }
 0x462   :  { %1335 = vpow2.f32 %v796_v18 }
 0x46c   :  { %v1336_v19 = vpop.eup %1335 }
 0x46d   :  { %v798_v20 = vsel %vm787_vm8, %v1336_v19, 0.0 }
 0x46e   :  { %799 = vadd.xlane.f32.xlu1 %v798_v20 }
 0x4fb   :  { %v800_v21 = vpop.xlane.xlu1 %799 }
 0x4fc   :  { %1337 = vlog2.f32 %v800_v21 }
 0x506   :  { %v1338_v22 = vpop.eup %1337 }
 0x507   :  { %v802_v25 = vmul.f32 0.6931472, %v1338_v22 }
 0x509   :  { %v803_v23 = vadd.f32 %v802_v25, %v794_v16 }
 0x50b   :  { %v824_v24 = vsel %vm823_vm10, %v803_v23, 0.0 }
 0x50c   :  { %825 = vadd.xlane.f32.xlu1 %v824_v24 }
 0x510   :  { %854 = vadd.xlane.f32.xlu1 %v853_v27 }
 0x511   :  { %1460 = shalt.err (!%p1457_p2)
}
 0x512   :  { %s1461_s29 = scalar_lea.hbm %s1772_s9, 128 }
 0x513   :  { %p1462_p3 = scmp.ne.s32.totalorder %s1772_s9, %s1461_s29  ;;  %p1465_p4 = scmp.lt.u32.totalorder %s1461_s29, %s1772_s9 }
 0x515   :  { %p1467_p5 = pnand %p1465_p4, %p1462_p3 }
 0x517   :  { %1470 = shalt.err (!%p1467_p5)
}
 0x518   :  { %888 = dma.vmem_to_hbm [thread:$0]  %s886_s7, 128, %s1772_s9, [#allocation14]  }
 0x519   :  { %s1471_s17 = scalar_lea.vmem %s876_s18, 128  ;;  %p1476_p7 = scmp.lt.s32.totalorder %s876_s18, %s876_s18 }
 0x51a   :  { %p1472_p6 = scmp.ne.s32.totalorder %s876_s18, %s1471_s17  ;;  %p1477_p8 = scmp.lt.s32.totalorder %s1471_s17, %s1471_s17 }
 0x51c   :  { %p1478_p9 = por %p1477_p8, %p1476_p7 }
 0x51e   :  { %p1479_p10 = pnand %p1478_p9, %p1472_p6 }
 0x520   :  { %1482 = shalt.err (!%p1479_p10)
}
 0x521   :  { %s1483_s19 = scalar_lea.hbm %s1771_s8, 128 }
 0x522   :  { %p1484_p11 = scmp.ne.s32.totalorder %s1771_s8, %s1483_s19  ;;  %p1487_p12 = scmp.lt.u32.totalorder %s1483_s19, %s1771_s8 }
 0x524   :  { %p1489_p13 = pnand %p1487_p12, %p1484_p11 }
 0x526   :  { %1492 = shalt.err (!%p1489_p13)
}
 0x527   :  { %878 = dma.vmem_to_hbm [thread:$0]  %s876_s18, 128, %s1771_s8, [#allocation4]  }
 0x528   :  { %s1549_s28 = smov [#allocation15]  }
 0x529   :  { %s895_s22 = sshll.u32 %s1549_s28, 4  ;;  %s896_s22 = int_to_ptr.vmem [resolvable:$true] %s895_s22 }
 0x52a   :  { %s1493_s3 = scalar_lea.vmem %s896_s22, 128  ;;  %p1498_p1 = scmp.lt.s32.totalorder %s896_s22, %s896_s22 }
 0x52b   :  { %p1494_p0 = scmp.ne.s32.totalorder %s896_s22, %s1493_s3  ;;  %p1499_p2 = scmp.lt.s32.totalorder %s1493_s3, %s1493_s3 }
 0x52d   :  { %p1500_p3 = por %p1499_p2, %p1498_p1 }
 0x52f   :  { %p1501_p4 = pnand %p1500_p3, %p1494_p0 }
 0x531   :  { %1504 = shalt.err (!%p1501_p4)
}
 0x532   :  { %s1505_s7 = scalar_lea.hbm %s1773_s10, 128 }
 0x533   :  { %p1506_p5 = scmp.ne.s32.totalorder %s1773_s10, %s1505_s7  ;;  %p1509_p6 = scmp.lt.u32.totalorder %s1505_s7, %s1773_s10 }
 0x535   :  { %p1511_p7 = pnand %p1509_p6, %p1506_p5 }
 0x537   :  { %1514 = shalt.err (!%p1511_p7)
}
 0x538   :  { %898 = dma.vmem_to_hbm [thread:$0]  %s896_s22, 128, %s1773_s10, [#allocation14]   ;;  %v840_v28 = vpop.xlane.xlu0 %839 }
 0x539   :  { %v841_v29 = vrot.slane %v840_v28, 4  ;;  %s1515_s19 = scalar_lea.hbm %s1774_s11, 16 }
 0x53a   :  { %p1516_p8 = scmp.ne.s32.totalorder %s1774_s11, %s1515_s19  ;;  %p1519_p9 = scmp.lt.u32.totalorder %s1515_s19, %s1774_s11 }
 0x53b   :  { %v842_v30 = vadd.f32 %v841_v29, %v840_v28 }
 0x53c   :  { %p1521_p10 = pnand %p1519_p9, %p1516_p8 }
 0x53d   :  { %v843_v31 = vrot.slane %v842_v30, 2 }
 0x53f   :  { %v844_v35 = vadd.f32 %v843_v31, %v842_v30 }
 0x541   :  { %v845_v41 = vrot.slane %v844_v35, 1 }
 0x543   :  { %v846_v46 = vadd.f32 %v845_v41, %v844_v35 }
 0x599   :  { %v826_v32 = vpop.xlane.xlu1 %825 }
 0x59a   :  { %v827_v33 = vrot.slane %v826_v32, 4 }
 0x59c   :  { %v828_v34 = vadd.f32 %v827_v33, %v826_v32 }
 0x59d   :  { %v855_v36 = vpop.xlane.xlu1 %854 }
 0x59e   :  { %v829_v37 = vrot.slane %v828_v34, 2  ;;  %v856_v38 = vrot.slane %v855_v36, 4 }
 0x5a0   :  { %v857_v39 = vadd.f32 %v856_v38, %v855_v36  ;;  %v830_v40 = vadd.f32 %v829_v37, %v828_v34 }
 0x5a2   :  { %v858_v42 = vrot.slane %v857_v39, 2  ;;  %v831_v43 = vrot.slane %v830_v40, 1 }
 0x5a4   :  { %v859_v44 = vadd.f32 %v858_v42, %v857_v39  ;;  %v832_v45 = vadd.f32 %v831_v43, %v830_v40 }
 0x5a6   :  { %1289 = vpush %v832_v45  ;;  %v860_v47 = vrot.slane %v859_v44, 1 }
 0x5a7   :  { %1291 = vpush %v846_v46 }
 0x5a8   :  { %v861_v48 = vadd.f32 %v860_v47, %v859_v44 }
 0x5aa   :  { %1293 = vpush %v861_v48 }
 0x5d7   :  { %s1290_s10 = spop %1289 }
 0x5d8   :  { %s836_s29 = smul.f32 0.125, %s1290_s10  ;;  %s1292_s0 = spop %1291 }
 0x5d9   :  { %s850_s15 = smul.f32 0.125, %s1292_s0 }
 0x5db   :  { %s851_s30 = sadd.f32 %s850_s15, %s836_s29  ;;  %s1294_s12 = spop %1293 }
 0x5dc   :  { %s865_s14 = smul.f32 0.125, %s1294_s12 }
 0x5dd   :  { %s852_s16 = smul.f32 0.5, %s851_s30 }
 0x5df   :  { %s866_s17 = ssub.f32 %s852_s16, %s865_s14 }
 0x5e1   :  { %868 = sst [smem:[#allocation16]] %s866_s17 }
 0x5e2   :  { %1524 = shalt.err (!%p1521_p10)
}
 0x5e3   :  { %s1550_s9 = smov [#allocation16]  }
 0x5e4   :  { %906 = dma.smem_to_hbm %s1550_s9, 16, %s1774_s11, [#allocation5]  }
 0x5e5   :  { %1531 = dma.done.wait [#allocation4], 128  }
 0x5e6   :  { %1532 = vsyncadd [#allocation4], 4294967168 }
 0x5e7   :  { %1533 = dma.done.wait [#allocation14], 256  }
 0x5e8   :  { %1534 = vsyncadd [#allocation14], 4294967040 }
 0x5e9   :  { %1535 = dma.done.wait [#allocation5], 16  }
 0x5ea   :  { %1536 = vsyncadd [#allocation5], 4294967280 }
 0x5eb   :  { %919 = sfence }
 0x5ec   :  { %920 = vsyncpa [#allocation3], 1 }
 0x5ed   :  { %921 = vsyncpa [#allocation7], 1 }
 0x5ee   :  { %922 = vsyncpa [#allocation10], 1 }
 0x5ef   :  { %923 = vsyncpa [#allocation4], 1 }
 0x5f0   :  { %924 = vsyncpa [#allocation14], 1 }
 0x5f1   :  { %925 = vsyncpa [#allocation5], 1 }

</bundles_post_ra>
